<compile_context>
chip_gen: v6e
topology: v6e:2x2x1
jax: 0.10.0
libtpu: 0.0.40
codegen_flags: <defaults>
</compile_context>

<pallas_src>
import functools

import jax
import jax.numpy as jnp
import numpy as np
from jax import lax
from jax.experimental import pallas as pl
from jax.experimental.pallas import tpu as pltpu

EPS = 1e-5


def conv_bn_relu_kernel(p_ref, w_ref, prm_ref, o_ref):
    """p_ref: (K, M) im2col patches, K = Cin*KH*KW, M = N*H*W.
    w_ref: (Cout, K) reshaped OIHW weights.
    prm_ref: (Cout, 3) packed [bias, gamma, beta].
    o_ref: (Cout, M) output (lane-dense, M is a multiple of 128)."""
    # Conv as a single MXU matmul with f32 accumulation.
    acc = jnp.dot(w_ref[...], p_ref[...],
                  preferred_element_type=jnp.float32)            # (Cout, M)
    acc = acc + prm_ref[:, 0:1]                                  # conv bias

    # BatchNorm2d (training-mode forward): batch statistics over (N, H, W)
    # == lane axis of acc; biased variance via E[x^2] - mean^2; eps=1e-5.
    m = acc.shape[1]
    inv_m = jnp.float32(1.0 / m)
    mean = jnp.sum(acc, axis=1, keepdims=True) * inv_m           # (Cout, 1)
    msq = jnp.sum(acc * acc, axis=1, keepdims=True) * inv_m      # (Cout, 1)
    var = msq - mean * mean
    inv = lax.rsqrt(var + EPS)

    scale = prm_ref[:, 1:2] * inv                                # gamma * inv_std
    shift = prm_ref[:, 2:3] - mean * scale                       # beta - mean*scale
    y = acc * scale + shift

    # ReLU (fused, VPU).
    o_ref[...] = jnp.maximum(y, 0.0).astype(o_ref.dtype)


@functools.partial(jax.jit, static_argnames=("padding",))
def conv2d_batchnorm_relu(x_nchw, w_oihw, bias, gamma, beta, *, padding=1):
    """Forward of conv2DBatchNormRelu (stride=1, dilation=1).
    x_nchw: (N, Cin, H, W); w_oihw: (Cout, Cin, KH, KW)."""
    N, Cin, H, W = x_nchw.shape
    Cout, _, KH, KW = w_oihw.shape
    Hout = H + 2 * padding - KH + 1
    Wout = W + 2 * padding - KW + 1
    M = N * Hout * Wout
    K = Cin * KH * KW

    # --- im2col (layout plumbing in plain JAX, directly from NCHW) ---
    x_pad = jnp.pad(
        x_nchw.astype(jnp.float32),
        ((0, 0), (0, 0), (padding, padding), (padding, padding)))
    cols = [x_pad[:, :, kh:kh + Hout, kw:kw + Wout]
            for kh in range(KH) for kw in range(KW)]              # each (N,Cin,Hout,Wout)
    patches = jnp.stack(cols, axis=2)                             # (N, Cin, KH*KW, Hout, Wout)
    patches = patches.reshape(N, K, Hout * Wout)                  # contraction = (Cin, kh, kw)
    patches = patches.transpose(1, 0, 2).reshape(K, M)            # (K, N*Hout*Wout)

    w2 = w_oihw.reshape(Cout, K).astype(jnp.float32)              # (Cout, K), matches ordering
    prm = jnp.stack([bias, gamma, beta], axis=1).astype(jnp.float32)  # (Cout, 3)

    out = pl.pallas_call(
        conv_bn_relu_kernel,
        out_shape=jax.ShapeDtypeStruct((Cout, M), jnp.float32),
        in_specs=[
            pl.BlockSpec(memory_space=pltpu.MemorySpace.VMEM),
            pl.BlockSpec(memory_space=pltpu.MemorySpace.VMEM),
            pl.BlockSpec(memory_space=pltpu.MemorySpace.VMEM),
        ],
        out_specs=pl.BlockSpec(memory_space=pltpu.MemorySpace.VMEM),
    )(patches, w2, prm)

    # (Cout, N*H*W) -> (N, Cout, H, W); tiny (16 KB) permute back to NCHW.
    return out.reshape(Cout, N, Hout, Wout).transpose(1, 0, 2, 3)


def reference(x_nchw, w_oihw, bias, gamma, beta, padding=1):
    conv = lax.conv_general_dilated(
        x_nchw, w_oihw, window_strides=(1, 1),
        padding=((padding, padding), (padding, padding)),
        dimension_numbers=("NCHW", "OIHW", "NCHW"))
    conv = conv + bias.reshape(1, -1, 1, 1)
    mean = jnp.mean(conv, axis=(0, 2, 3), keepdims=True)
    var = jnp.mean((conv - mean) ** 2, axis=(0, 2, 3), keepdims=True)
    y = (conv - mean) * lax.rsqrt(var + EPS) * gamma.reshape(1, -1, 1, 1) \
        + beta.reshape(1, -1, 1, 1)
    return jnp.maximum(y, 0.0)


if __name__ == "__main__":
    # conv2DBatchNormRelu(in_channels=4, n_filters=8, k_size=3, stride=1,
    #                     padding=1, bias=True, dilation=1, with_bn=True)
    N, Cin, H, W = 2, 4, 16, 16
    Cout, Ksz = 8, 3

    key = jax.random.PRNGKey(0)
    k_x, k_w, k_b, k_g, k_be = jax.random.split(key, 5)

    x = jax.random.normal(k_x, (N, Cin, H, W), dtype=jnp.float32)
    fan_in = Cin * Ksz * Ksz
    bound = 1.0 / np.sqrt(fan_in)
    w = jax.random.uniform(k_w, (Cout, Cin, Ksz, Ksz), minval=-bound, maxval=bound,
                           dtype=jnp.float32)
    b = jax.random.uniform(k_b, (Cout,), minval=-bound, maxval=bound,
                           dtype=jnp.float32)
    # Synthetic (deterministic) BN affine params; PyTorch default is gamma=1, beta=0.
    gamma = 1.0 + 0.1 * jax.random.normal(k_g, (Cout,), dtype=jnp.float32)
    beta = 0.1 * jax.random.normal(k_be, (Cout,), dtype=jnp.float32)

    out = conv2d_batchnorm_relu(x, w, b, gamma, beta, padding=1)
    out = jax.block_until_ready(out)

    ref = reference(x, w, b, gamma, beta, padding=1)
    np.testing.assert_allclose(np.asarray(out), np.asarray(ref), rtol=1e-2, atol=1e-2)

    print("KERNEL_OK")
</pallas_src>

<mosaic_0001>
module attributes {stable_mosaic.version = 11 : i64} {
  func.func @conv_bn_relu_kernel(%arg0: memref<36x512xf32, #tpu.memory_space<vmem>>, %arg1: memref<8x36xf32, #tpu.memory_space<vmem>>, %arg2: memref<8x3xf32, #tpu.memory_space<vmem>>, %arg3: memref<8x512xf32, #tpu.memory_space<vmem>>) attributes {dimension_semantics = [], scalar_prefetch = 0 : i64, scratch_operands = 0 : i64, tpu.core_type = #tpu.core_type<tc>} {
    %c0 = arith.constant 0 : index
    %c0_0 = arith.constant 0 : index
    %0 = vector.load %arg1[%c0, %c0_0] : memref<8x36xf32, #tpu.memory_space<vmem>>, vector<8x36xf32>
    %c0_1 = arith.constant 0 : index
    %c0_2 = arith.constant 0 : index
    %1 = vector.load %arg0[%c0_1, %c0_2] : memref<36x512xf32, #tpu.memory_space<vmem>>, vector<36x512xf32>
    %cst = arith.constant dense<0.000000e+00> : vector<8x512xf32>
    %2 = tpu.matmul %0, %1, %cst {dimension_numbers = #tpu.dot_dimension_numbers<[1], [0], [0], [1], [0, 0, 1, 1], [], []>} : vector<8x36xf32>, vector<36x512xf32>, vector<8x512xf32> -> vector<8x512xf32>
    %c0_3 = arith.constant 0 : index
    %c0_4 = arith.constant 0 : index
    %3 = vector.load %arg2[%c0_3, %c0_4] : memref<8x3xf32, #tpu.memory_space<vmem>>, vector<8x1xf32>
    %4 = vector.broadcast %3 : vector<8x1xf32> to vector<8x512xf32>
    %5 = arith.addf %2, %4 : vector<8x512xf32>
    %cst_5 = arith.constant dense<0.000000e+00> : vector<8xf32>
    %6 = vector.multi_reduction <add>, %5, %cst_5 [1] : vector<8x512xf32> to vector<8xf32>
    %7 = vector.shape_cast %6 : vector<8xf32> to vector<8x1xf32>
    %cst_6 = arith.constant 0.001953125 : f32
    %8 = vector.broadcast %cst_6 : f32 to vector<8x1xf32>
    %9 = arith.mulf %7, %8 : vector<8x1xf32>
    %10 = arith.mulf %5, %5 : vector<8x512xf32>
    %cst_7 = arith.constant dense<0.000000e+00> : vector<8xf32>
    %11 = vector.multi_reduction <add>, %10, %cst_7 [1] : vector<8x512xf32> to vector<8xf32>
    %12 = vector.shape_cast %11 : vector<8xf32> to vector<8x1xf32>
    %cst_8 = arith.constant 0.001953125 : f32
    %13 = vector.broadcast %cst_8 : f32 to vector<8x1xf32>
    %14 = arith.mulf %12, %13 : vector<8x1xf32>
    %15 = arith.mulf %9, %9 : vector<8x1xf32>
    %16 = arith.subf %14, %15 : vector<8x1xf32>
    %cst_9 = arith.constant 9.99999974E-6 : f32
    %17 = vector.broadcast %cst_9 : f32 to vector<8x1xf32>
    %18 = arith.addf %16, %17 : vector<8x1xf32>
    %19 = math.rsqrt %18 : vector<8x1xf32>
    %c0_10 = arith.constant 0 : index
    %c1 = arith.constant 1 : index
    %20 = vector.load %arg2[%c0_10, %c1] : memref<8x3xf32, #tpu.memory_space<vmem>>, vector<8x1xf32>
    %21 = arith.mulf %20, %19 : vector<8x1xf32>
    %c0_11 = arith.constant 0 : index
    %c2 = arith.constant 2 : index
    %22 = vector.load %arg2[%c0_11, %c2] : memref<8x3xf32, #tpu.memory_space<vmem>>, vector<8x1xf32>
    %23 = arith.mulf %9, %21 : vector<8x1xf32>
    %24 = arith.subf %22, %23 : vector<8x1xf32>
    %25 = vector.broadcast %21 : vector<8x1xf32> to vector<8x512xf32>
    %26 = arith.mulf %5, %25 : vector<8x512xf32>
    %27 = vector.broadcast %24 : vector<8x1xf32> to vector<8x512xf32>
    %28 = arith.addf %26, %27 : vector<8x512xf32>
    %cst_12 = arith.constant 0.000000e+00 : f32
    %29 = vector.broadcast %cst_12 : f32 to vector<8x512xf32>
    %30 = arith.maximumf %28, %29 : vector<8x512xf32>
    %c0_13 = arith.constant 0 : index
    %c0_14 = arith.constant 0 : index
    %31 = vector.load %arg3[%c0_13, %c0_14] : memref<8x512xf32, #tpu.memory_space<vmem>>, vector<8x512xf32>
    tpu.vector_store %arg3[%c0_13, %c0_14], %30 {strides = array<i32>} : memref<8x512xf32, #tpu.memory_space<vmem>>, vector<8x512xf32>,
    return
  }
}

</mosaic_0001>

<bundles_post_ra>
// kernel: conv2d_batchnorm_relu.1
= control target key start
LH: loop header
LB: loop body
LE: loop exit
PB: predicated region body
PF: predicated region fallthrough
CT: control target
= control target key end

     0   :  { %vm45_vm0 = vcmask 1043456   ;;  %v274_v3 = vmov 0.0   ;;  %vm41_vm1 = vcmask 293888   ;;  %v275_v23 = vmov 0   ;;  %s377_s0 = inlined_call_operand.vmem [shape: f32[36,512], index: 0, kind: input, shape index: {}]   ;;  %s378_s1 = inlined_call_operand.vmem [shape: f32[8,36], index: 1, kind: input, shape index: {}]   ;;  %s379_s2 = inlined_call_operand.vmem [shape: f32[8,3], index: 2, kind: input, shape index: {}]   ;;  %s380_s3 = inlined_call_operand.vmem [shape: f32[8,512], index: 3, kind: output, shape index: {}]  }
   0x1   :  { %v32_v0 = vld [vmem:[%s377_s0 + $0x88] sm:$0xf]  ;;  %v34_v1 = vld [vmem:[%s377_s0 + $0x98] sm:$0xf]  ;;  %v31_v2 = vld [vmem:[%s377_s0 + $0x80] sm:$0xf]  ;;  %122 = vmatprep.mubr.f32.mxu0 %v274_v3  ;;  %193 = vmatprep.mubr.f32.mxu1 %v274_v3 }
   0x2   :  { %257 = vmatprep.subr.msk.mxu0 %vm45_vm0, %v32_v0  ;;  %260 = vmatprep.subr.msk.mxu1 %vm45_vm0, %v34_v1  ;;  %v33_v4 = vld [vmem:[%s377_s0 + $0x90] sm:$0xf]  ;;  %v28_v5 = vld [vmem:[%s377_s0 + $0x68] sm:$0xff]  ;;  %v30_v6 = vld [vmem:[%s377_s0 + $0x78] sm:$0xff]  ;;  %v276_v43 = vmov 1   ;;  %v277_v51 = vmov 2  }
   0x3   :  { %258 = vmatpush1.msk.msra.mxu0 %vm45_vm0, %v31_v2  ;;  %261 = vmatpush1.msk.msra.mxu1 %vm45_vm0, %v33_v4  ;;  %v27_v7 = vld [vmem:[%s377_s0 + $0x60] sm:$0xff]  ;;  %v29_v8 = vld [vmem:[%s377_s0 + $0x70] sm:$0xff]  ;;  %v24_v9 = vld [vmem:[%s377_s0 + $0x48] sm:$0xff] }
   0x4   :  { %82 = vmatprep.subr.mxu0 %v28_v5  ;;  %153 = vmatprep.subr.mxu1 %v30_v6  ;;  %v26_v10 = vld [vmem:[%s377_s0 + $0x58] sm:$0xff]  ;;  %v23_v11 = vld [vmem:[%s377_s0 + $0x40] sm:$0xff]  ;;  %v25_v12 = vld [vmem:[%s377_s0 + $0x50] sm:$0xff] }
   0x5   :  { %83 = vmatpush1.msra.mxu0 %v27_v7  ;;  %154 = vmatpush1.msra.mxu1 %v29_v8  ;;  %v20_v13 = vld [vmem:[%s377_s0 + $0x28] sm:$0xff]  ;;  %v22_v14 = vld [vmem:[%s377_s0 + $0x38] sm:$0xff]  ;;  %v19_v15 = vld [vmem:[%s377_s0 + $0x20] sm:$0xff] }
   0x6   :  { %84 = vmatprep.subr.mxu0 %v24_v9  ;;  %155 = vmatprep.subr.mxu1 %v26_v10  ;;  %v21_v16 = vld [vmem:[%s377_s0 + $0x30] sm:$0xff]  ;;  %v16_v17 = vld [vmem:[%s377_s0 + $0x8] sm:$0xff]  ;;  %v18_v18 = vld [vmem:[%s377_s0 + $0x18] sm:$0xff] }
   0x7   :  { %85 = vmatpush1.msra.mxu0 %v23_v11  ;;  %156 = vmatpush1.msra.mxu1 %v25_v12  ;;  %v15_v19 = vld [vmem:[%s377_s0] sm:$0xff]  ;;  %v17_v20 = vld [vmem:[%s377_s0 + $0x10] sm:$0xff]  ;;  %s278_s0 = smov 1  }
   0x8   :  { %86 = vmatprep.subr.mxu0 %v20_v13  ;;  %157 = vmatprep.subr.mxu1 %v22_v14  ;;  %v14_v21 = vld [vmem:[%s378_s1] sm:$0xff] }
   0x9   :  { %87 = vmatpush1.msra.mxu0 %v19_v15  ;;  %158 = vmatpush1.msra.mxu1 %v21_v16  ;;  %v35_v22 = vld [vmem:[%s379_s2] sm:$0xff] }
   0xa   :  { %88 = vmatprep.subr.mxu0 %v16_v17  ;;  %159 = vmatprep.subr.mxu1 %v18_v18 }
   0xb   :  { %89 = vmatpush1.msra.mxu0 %v15_v19  ;;  %160 = vmatpush1.msra.mxu1 %v17_v20 }
   0xc   :  { %259 = vmatmul.mubr.msk.f32.vlgmr.msra.gmra.mxu0 %vm41_vm1, %v14_v21  ;;  %262 = vmatmul.mubr.msk.f32.vlgmr.msra.gmra.mxu1 %vm41_vm1, %v14_v21 }
   0xd   :  { %268 = vset.pattern.permute.xlu0 %v275_v23  ;;  %269 = vset.pattern.permute.xlu1 %v276_v43 }
   0xe   :  { %38 = vperm.xlu0 %268, %v35_v22  }
  0x12   :  { %271 = vset.pattern.permute.xlu0 %v277_v51 }
  0x89   :  { %v39_v24 = vpop.permute.xlu0 %38 }
  0xcc   :  { %v124_v25 = vpop.f32.mrf.mxu0  ;;  %v195_v26 = vpop.f32.mrf.mxu1 }
  0xcd   :  { %v125_v27 = vadd.f32 %v124_v25, %v39_v24  ;;  %v196_v30 = vadd.f32 %v195_v26, %v39_v24 }
  0xce   :  { %v126_v28 = vpop.f32.mrf.mxu0  ;;  %v197_v29 = vpop.f32.mrf.mxu1 }
  0xcf   :  { %v127_v31 = vadd.f32 %v126_v28, %v39_v24  ;;  %v206_v32 = vmul.f32 %v125_v27, %v125_v27  ;;  %v198_v35 = vadd.f32 %v197_v29, %v39_v24  ;;  %v208_v37 = vmul.f32 %v196_v30, %v196_v30 }
  0xd1   :  { %v200_v33 = vadd.f32 %v127_v31, %v125_v27  ;;  %v207_v34 = vmul.f32 %v127_v31, %v127_v31  ;;  %v209_v40 = vmul.f32 %v198_v35, %v198_v35 }
  0xd3   :  { %v201_v36 = vadd.f32 %v200_v33, %v196_v30  ;;  %v210_v38 = vadd.f32 %v207_v34, %v206_v32 }
  0xd5   :  { %v202_v39 = vadd.f32 %v201_v36, %v198_v35  ;;  %v211_v41 = vadd.f32 %v210_v38, %v208_v37 }
  0xd7   :  { %203 = vadd.xlane.f32.xlu0 %v202_v39  ;;  %v212_v42 = vadd.f32 %v211_v41, %v209_v40 }
  0xd9   :  { %213 = vadd.xlane.f32.xlu1 %v212_v42 }
 0x160   :  { %v204_v44 = vpop.xlane.xlu0 %203 }
 0x161   :  { %v205_v45 = vmul.f32 0.001953125, %v204_v44 }
 0x162   :  { %v214_v46 = vpop.xlane.xlu1 %213 }
 0x163   :  { %v216_v47 = vmul.f32 %v205_v45, %v205_v45  ;;  %v215_v48 = vmul.f32 0.001953125, %v214_v46 }
 0x165   :  { %v217_v49 = vsub.f32 %v215_v48, %v216_v47 }
 0x167   :  { %v218_v50 = vadd.f32 1e-05, %v217_v49 }
 0x169   :  { %272 = vrsqrt.f32 %v218_v50 }
 0x176   :  { %v273_v52 = vpop.eup %272 }
 0x177   :  { %v220_v53 = vmul.f32 %v273_v52, %v35_v22 }
 0x179   :  { %v221_v54 = vmul.f32 %v220_v53, %v205_v45 }
 0x17b   :  { %223 = vrot.lane.b32.xlu1 %v221_v54, %s278_s0 }
 0x17f   :  { %229 = vperm.xlu1 %269, %v220_v53  }
 0x183   :  { %270 = vset.pattern.permute.xlu1 %v277_v51 }
 0x1ed   :  { %v224_v55 = vpop.permute.xlu1 %223 }
 0x1ee   :  { %v226_v56 = vsub.f32 %v35_v22, %v224_v55 }
 0x1f0   :  { %238 = vperm.xlu1 %270, %v226_v56  }
 0x1fa   :  { %v230_v57 = vpop.permute.xlu1 %229 }
 0x1fb   :  { %v232_v58 = vmul.f32 %v230_v57, %v125_v27  ;;  %v233_v59 = vmul.f32 %v230_v57, %v127_v31  ;;  %v234_v60 = vmul.f32 %v230_v57, %v196_v30  ;;  %v235_v61 = vmul.f32 %v230_v57, %v198_v35 }
 0x26b   :  { %v239_v62 = vpop.permute.xlu1 %238 }
 0x26c   :  { %v241_v63 = vadd.f32 %v239_v62, %v232_v58  ;;  %v242_v0 = vadd.f32 %v239_v62, %v233_v59  ;;  %v243_v1 = vadd.f32 %v239_v62, %v234_v60  ;;  %v244_v2 = vadd.f32 %v239_v62, %v235_v61 }
 0x26e   :  { %v245_v3 = vmax.f32 %v241_v63, 0.0  ;;  %v246_v4 = vmax.f32 %v242_v0, 0.0  ;;  %v247_v5 = vmax.f32 %v243_v1, 0.0  ;;  %v248_v6 = vmax.f32 %v244_v2, 0.0 }
 0x270   :  { %249 = vst [vmem:[%s380_s3] sm:$0xff] %v245_v3  ;;  %250 = vst [vmem:[%s380_s3 + $0x8] sm:$0xff] %v246_v4 }
 0x271   :  { %251 = vst [vmem:[%s380_s3 + $0x10] sm:$0xff] %v247_v5  ;;  %252 = vst [vmem:[%s380_s3 + $0x18] sm:$0xff] %v248_v6 }

</bundles_post_ra>
